<compile_context>
chip_gen: v7x
topology: tpu7x:2x2x1
jax: 0.10.0
libtpu: 0.0.40
codegen_flags: <defaults>
</compile_context>

<pallas_src>
import jax
import jax.numpy as jnp
from jax.experimental import pallas as pl
from jax.experimental.pallas import tpu as pltpu


def _elu(x):
    # nn.ELU(), alpha=1; clamp the exp argument so the unused branch is safe.
    return jnp.where(x > 0, x, jnp.exp(jnp.minimum(x, 0.0)) - 1.0)


def make_decoder_block(C, stride, T, dilations=(1, 3, 9), k_res=7):
    CIN = 2 * C                    # in_channels = out_channels * 2
    KT = 2 * stride                # transposed-conv kernel size
    L = T * stride                 # output length after the causal trim
    n_res = len(dilations)

    def kernel(x_ref, wtc_ref, sel0_ref, bt_ref, w1c_ref, b1_ref, w2t_ref,
               b2_ref, o_ref):
        def shift_time(a, s):
            # Causal shift along the time (lane) axis: y[:, t] = a[:, t - s],
            # zeros for t < s.  Static s, in-register only.
            if s == 0:
                return a
            n = a.shape[-1]
            if s >= n:
                return jnp.zeros_like(a)
            pad = jnp.zeros(a.shape[:-1] + (s,), a.dtype)
            return jnp.concatenate([pad, a[..., : n - s]], axis=-1)

        x = x_ref[...]                                            # (CIN, T) bf16

        # ---- CausalConvTranspose1d ----
        # Zero-upsample in-register via a 0/1 selection matmul (exact in bf16):
        #   u[:, q*stride] = x[:, q], zeros elsewhere.
        u = jnp.dot(x, sel0_ref[...],
                    preferred_element_type=jnp.float32).astype(jnp.bfloat16)  # (CIN, L)
        # All KT taps fused into one im2col matmul with K = KT*CIN.
        slab_u = jnp.concatenate([shift_time(u, k) for k in range(KT)],
                                 axis=0)                          # (KT*CIN, L) bf16
        h = jnp.dot(wtc_ref[...], slab_u,
                    preferred_element_type=jnp.float32) + bt_ref[...]  # (C, L) f32

        # ---- ResidualUnits (dilation 1, 3, 9) ----
        for i, d in enumerate(dilations):
            hb = h.astype(jnp.bfloat16)
            # im2col slab: one fused (C, 7C) x (7C, L) matmul instead of 7 taps.
            slab = jnp.concatenate(
                [shift_time(hb, (k_res - 1 - k) * d) for k in range(k_res)],
                axis=0)                                           # (7C, L) bf16
            t = jnp.dot(w1c_ref[i], slab,
                        preferred_element_type=jnp.float32) + b1_ref[i]
            t = _elu(t)
            t = jnp.dot(w2t_ref[i], t.astype(jnp.bfloat16),
                        preferred_element_type=jnp.float32) + b2_ref[i]
            t = _elu(t)
            h = h + t

        o_ref[...] = h.astype(o_ref.dtype)                        # (C, L) NCL slice

    def forward(x_ncl, params):
        wt, bt, w1, b1, w2, b2 = params
        B = x_ncl.shape[0]
        assert x_ncl.shape == (B, CIN, T) and wt.shape[0] == KT

        # Activations enter as bf16, NCL, untouched (no transpose, no upsample).
        xb = x_ncl.astype(jnp.bfloat16)

        # Matmul-ready weight repack (tiny, weights only, fused by XLA once).
        wt_cat = jnp.transpose(wt, (2, 0, 1)).reshape(
            C, KT * CIN).astype(jnp.bfloat16)                      # (C, KT*CIN)
        sel0 = (jnp.arange(L)[None, :] ==
                jnp.arange(T)[:, None] * stride).astype(jnp.bfloat16)  # (T, L)
        bt_col = jnp.reshape(bt, (C, 1)).astype(jnp.float32)
        w1_cat = jnp.transpose(w1, (0, 3, 1, 2)).reshape(
            n_res, C, k_res * C).astype(jnp.bfloat16)              # (3, C, 7C)
        b1_col = jnp.transpose(b1, (0, 2, 1)).astype(jnp.float32)  # (3, C, 1)
        w2_t = jnp.transpose(w2, (0, 2, 1)).astype(jnp.bfloat16)   # (3, C, C)
        b2_col = jnp.transpose(b2, (0, 2, 1)).astype(jnp.float32)  # (3, C, 1)

        def full(shape):
            n = len(shape)
            return pl.BlockSpec(shape, lambda b, n=n: (0,) * n)

        out = pl.pallas_call(
            kernel,
            out_shape=jax.ShapeDtypeStruct((B, C, L), jnp.float32),
            grid_spec=pltpu.PrefetchScalarGridSpec(
                num_scalar_prefetch=0,
                grid=(B,),
                in_specs=[
                    pl.BlockSpec((None, CIN, T), lambda b: (b, 0, 0)),  # x, NCL
                    full(wt_cat.shape), full(sel0.shape), full(bt_col.shape),
                    full(w1_cat.shape), full(b1_col.shape),
                    full(w2_t.shape), full(b2_col.shape),
                ],
                out_specs=pl.BlockSpec((None, C, L), lambda b: (b, 0, 0)),
            ),
            compiler_params=pltpu.CompilerParams(
                dimension_semantics=("parallel",),
                vmem_limit_bytes=32 * 1024 * 1024),
        )(xb, wt_cat, sel0, bt_col, w1_cat, b1_col, w2_t, b2_col)
        return out                                    # already NCL: (B, C, L)

    return forward


def ref_decoder_block(x_ncl, params, C, stride, dilations=(1, 3, 9), k_res=7,
                      emulate_bf16=False):
    """Pure-JAX reference (PyTorch semantics).  With emulate_bf16=True the
    matmul operands are rounded to bf16 (f32 accumulation), matching the
    kernel's MXU numerics."""
    wt, bt, w1, b1, w2, b2 = params
    q = ((lambda a: a.astype(jnp.bfloat16).astype(jnp.float32))
         if emulate_bf16 else (lambda a: a))
    B, CIN, T = x_ncl.shape
    L = T * stride
    KT = 2 * stride
    u = jnp.zeros((B, L, CIN), jnp.float32).at[:, ::stride, :].set(
        jnp.transpose(x_ncl, (0, 2, 1)).astype(jnp.float32))

    def shift_t(a, s):   # a: (B, L, C); y[:, t] = a[:, t - s], zeros for t < s
        if s == 0:
            return a
        if s >= a.shape[1]:
            return jnp.zeros_like(a)
        pad = jnp.zeros((a.shape[0], s, a.shape[2]), a.dtype)
        return jnp.concatenate([pad, a[:, :a.shape[1] - s]], axis=1)

    h = jnp.broadcast_to(bt[None], (B, L, C)).astype(jnp.float32)
    for k in range(KT):
        h = h + jnp.einsum('blc,co->blo', q(shift_t(u, k)), q(wt[k]))
    for i, d in enumerate(dilations):
        t = jnp.broadcast_to(b1[i][None], (B, L, C)).astype(jnp.float32)
        for k in range(k_res):
            s = (k_res - 1 - k) * d
            t = t + jnp.einsum('blc,co->blo', q(shift_t(h, s)), q(w1[i, k]))
        t = _elu(t)
        t = jnp.einsum('blc,co->blo', q(t), q(w2[i])) + b2[i][None]
        t = _elu(t)
        h = h + t
    return jnp.transpose(h, (0, 2, 1))


if __name__ == "__main__":
    # Small but lane-dense demo shapes: L = T*stride = 128 output lanes,
    # KT*CIN = 128 contraction depth for the fused transposed-conv matmul.
    B, C, stride, T = 2, 16, 2, 64        # out_channels=16, stride=2
    CIN = 2 * C

    key = jax.random.PRNGKey(0)
    ks = jax.random.split(key, 7)
    # Deterministic synthetic parameters (shapes follow the PyTorch module):
    #   ConvTranspose1d weight (Cin, Cout, 2*stride)  -> stored as (2*stride, Cin, Cout)
    #   Conv1d k=7 weight (Cout, Cin, 7)              -> stored as (3, 7, Cin, Cout)
    #   Conv1d k=1 weight (Cout, Cin, 1)              -> stored as (3, Cin, Cout)
    wt = 0.1 * jax.random.normal(ks[0], (2 * stride, CIN, C), jnp.float32)
    bt = 0.1 * jax.random.normal(ks[1], (1, C), jnp.float32)
    w1 = 0.1 * jax.random.normal(ks[2], (3, 7, C, C), jnp.float32)
    b1 = 0.1 * jax.random.normal(ks[3], (3, 1, C), jnp.float32)
    w2 = 0.1 * jax.random.normal(ks[4], (3, C, C), jnp.float32)
    b2 = 0.1 * jax.random.normal(ks[5], (3, 1, C), jnp.float32)
    params = (wt, bt, w1, b1, w2, b2)

    x = jax.random.normal(ks[6], (B, CIN, T), jnp.float32)   # NCL, like PyTorch

    fwd = jax.jit(make_decoder_block(C, stride, T))
    y = jax.block_until_ready(fwd(x, params))
    assert y.shape == (B, C, T * stride), y.shape

    # Structural check: reference with bf16-rounded matmul operands
    # (same numerics as the kernel's bf16 MXU inputs + f32 accumulation).
    y_b16 = ref_decoder_block(x, params, C, stride, emulate_bf16=True)
    err_b16 = float(jnp.max(jnp.abs(y - y_b16)))
    assert jnp.allclose(y, y_b16, atol=5e-3, rtol=5e-3), err_b16

    # Semantic sanity check against the exact f32 PyTorch-equivalent math
    # (tolerance accounts for bf16 operand rounding).
    y_f32 = ref_decoder_block(x, params, C, stride, emulate_bf16=False)
    err_f32 = float(jnp.max(jnp.abs(y - y_f32)))
    assert jnp.allclose(y, y_f32, atol=5e-2, rtol=5e-2), err_f32

    print("KERNEL_OK")
</pallas_src>

<mosaic_0001>
module attributes {stable_mosaic.version = 11 : i64} {
  func.func @kernel(%arg0: i32, %arg1: memref<1x32x64xbf16, #tpu.memory_space<vmem>>, %arg2: memref<16x128xbf16, #tpu.memory_space<vmem>>, %arg3: memref<64x128xbf16, #tpu.memory_space<vmem>>, %arg4: memref<16x1xf32, #tpu.memory_space<vmem>>, %arg5: memref<3x16x112xbf16, #tpu.memory_space<vmem>>, %arg6: memref<3x16x1xf32, #tpu.memory_space<vmem>>, %arg7: memref<3x16x16xbf16, #tpu.memory_space<vmem>>, %arg8: memref<3x16x1xf32, #tpu.memory_space<vmem>>, %arg9: memref<1x16x128xf32, #tpu.memory_space<vmem>>) attributes {dimension_semantics = [#tpu.dimension_semantics<parallel>], iteration_bounds = array<i64: 2>, scalar_prefetch = 0 : i64, scratch_operands = 0 : i64, tpu.core_type = #tpu.core_type<tc>, window_params = [{transform_indices = @transform_0, window_bounds = array<i64: 1, 32, 64>}, {pipeline_mode = #tpu.pipeline_mode<synchronous>, transform_indices = @transform_1, window_bounds = array<i64: 16, 128>}, {pipeline_mode = #tpu.pipeline_mode<synchronous>, transform_indices = @transform_2, window_bounds = array<i64: 64, 128>}, {pipeline_mode = #tpu.pipeline_mode<synchronous>, transform_indices = @transform_3, window_bounds = array<i64: 16, 1>}, {pipeline_mode = #tpu.pipeline_mode<synchronous>, transform_indices = @transform_4, window_bounds = array<i64: 3, 16, 112>}, {pipeline_mode = #tpu.pipeline_mode<synchronous>, transform_indices = @transform_5, window_bounds = array<i64: 3, 16, 1>}, {pipeline_mode = #tpu.pipeline_mode<synchronous>, transform_indices = @transform_6, window_bounds = array<i64: 3, 16, 16>}, {pipeline_mode = #tpu.pipeline_mode<synchronous>, transform_indices = @transform_7, window_bounds = array<i64: 3, 16, 1>}, {transform_indices = @transform_8, window_bounds = array<i64: 1, 16, 128>}]} {
    %c0 = arith.constant 0 : index
    %c0_0 = arith.constant 0 : index
    %c0_1 = arith.constant 0 : index
    %0 = vector.load %arg1[%c0, %c0_0, %c0_1] : memref<1x32x64xbf16, #tpu.memory_space<vmem>>, vector<1x32x64xbf16>
    %1 = vector.shape_cast %0 : vector<1x32x64xbf16> to vector<32x64xbf16>
    %c0_2 = arith.constant 0 : index
    %c0_3 = arith.constant 0 : index
    %2 = vector.load %arg3[%c0_2, %c0_3] : memref<64x128xbf16, #tpu.memory_space<vmem>>, vector<64x128xbf16>
    %cst = arith.constant dense<0.000000e+00> : vector<32x128xf32>
    %3 = tpu.matmul %1, %2, %cst {dimension_numbers = #tpu.dot_dimension_numbers<[1], [0], [0], [1], [0, 0, 1, 1], [], []>} : vector<32x64xbf16>, vector<64x128xbf16>, vector<32x128xf32> -> vector<32x128xf32>
    %4 = arith.truncf %3 : vector<32x128xf32> to vector<32x128xbf16>
    %cst_4 = arith.constant 0.000000e+00 : bf16
    %5 = vector.broadcast %cst_4 : bf16 to vector<32x1xbf16>
    %6 = vector.extract_strided_slice %4 {offsets = [0, 0], sizes = [32, 127], strides = [1, 1]} : vector<32x128xbf16> to vector<32x127xbf16>
    %7 = tpu.concatenate %5, %6 in 1 : vector<32x1xbf16>, vector<32x127xbf16> -> vector<32x128xbf16>
    %cst_5 = arith.constant 0.000000e+00 : bf16
    %8 = vector.broadcast %cst_5 : bf16 to vector<32x2xbf16>
    %9 = vector.extract_strided_slice %4 {offsets = [0, 0], sizes = [32, 126], strides = [1, 1]} : vector<32x128xbf16> to vector<32x126xbf16>
    %10 = tpu.concatenate %8, %9 in 1 : vector<32x2xbf16>, vector<32x126xbf16> -> vector<32x128xbf16>
    %cst_6 = arith.constant 0.000000e+00 : bf16
    %11 = vector.broadcast %cst_6 : bf16 to vector<32x3xbf16>
    %12 = vector.extract_strided_slice %4 {offsets = [0, 0], sizes = [32, 125], strides = [1, 1]} : vector<32x128xbf16> to vector<32x125xbf16>
    %13 = tpu.concatenate %11, %12 in 1 : vector<32x3xbf16>, vector<32x125xbf16> -> vector<32x128xbf16>
    %14 = tpu.concatenate %4, %7, %10, %13 in 0 : vector<32x128xbf16>, vector<32x128xbf16>, vector<32x128xbf16>, vector<32x128xbf16> -> vector<128x128xbf16>
    %c0_7 = arith.constant 0 : index
    %c0_8 = arith.constant 0 : index
    %15 = vector.load %arg2[%c0_7, %c0_8] : memref<16x128xbf16, #tpu.memory_space<vmem>>, vector<16x128xbf16>
    %cst_9 = arith.constant dense<0.000000e+00> : vector<16x128xf32>
    %16 = tpu.matmul %15, %14, %cst_9 {dimension_numbers = #tpu.dot_dimension_numbers<[1], [0], [0], [1], [0, 0, 1, 1], [], []>} : vector<16x128xbf16>, vector<128x128xbf16>, vector<16x128xf32> -> vector<16x128xf32>
    %c0_10 = arith.constant 0 : index
    %c0_11 = arith.constant 0 : index
    %17 = vector.load %arg4[%c0_10, %c0_11] : memref<16x1xf32, #tpu.memory_space<vmem>>, vector<16x1xf32>
    %18 = vector.broadcast %17 : vector<16x1xf32> to vector<16x128xf32>
    %19 = arith.addf %16, %18 : vector<16x128xf32>
    %20 = arith.truncf %19 : vector<16x128xf32> to vector<16x128xbf16>
    %cst_12 = arith.constant 0.000000e+00 : bf16
    %21 = vector.broadcast %cst_12 : bf16 to vector<16x6xbf16>
    %22 = vector.extract_strided_slice %20 {offsets = [0, 0], sizes = [16, 122], strides = [1, 1]} : vector<16x128xbf16> to vector<16x122xbf16>
    %23 = tpu.concatenate %21, %22 in 1 : vector<16x6xbf16>, vector<16x122xbf16> -> vector<16x128xbf16>
    %cst_13 = arith.constant 0.000000e+00 : bf16
    %24 = vector.broadcast %cst_13 : bf16 to vector<16x5xbf16>
    %25 = vector.extract_strided_slice %20 {offsets = [0, 0], sizes = [16, 123], strides = [1, 1]} : vector<16x128xbf16> to vector<16x123xbf16>
    %26 = tpu.concatenate %24, %25 in 1 : vector<16x5xbf16>, vector<16x123xbf16> -> vector<16x128xbf16>
    %cst_14 = arith.constant 0.000000e+00 : bf16
    %27 = vector.broadcast %cst_14 : bf16 to vector<16x4xbf16>
    %28 = vector.extract_strided_slice %20 {offsets = [0, 0], sizes = [16, 124], strides = [1, 1]} : vector<16x128xbf16> to vector<16x124xbf16>
    %29 = tpu.concatenate %27, %28 in 1 : vector<16x4xbf16>, vector<16x124xbf16> -> vector<16x128xbf16>
    %cst_15 = arith.constant 0.000000e+00 : bf16
    %30 = vector.broadcast %cst_15 : bf16 to vector<16x3xbf16>
    %31 = vector.extract_strided_slice %20 {offsets = [0, 0], sizes = [16, 125], strides = [1, 1]} : vector<16x128xbf16> to vector<16x125xbf16>
    %32 = tpu.concatenate %30, %31 in 1 : vector<16x3xbf16>, vector<16x125xbf16> -> vector<16x128xbf16>
    %cst_16 = arith.constant 0.000000e+00 : bf16
    %33 = vector.broadcast %cst_16 : bf16 to vector<16x2xbf16>
    %34 = vector.extract_strided_slice %20 {offsets = [0, 0], sizes = [16, 126], strides = [1, 1]} : vector<16x128xbf16> to vector<16x126xbf16>
    %35 = tpu.concatenate %33, %34 in 1 : vector<16x2xbf16>, vector<16x126xbf16> -> vector<16x128xbf16>
    %cst_17 = arith.constant 0.000000e+00 : bf16
    %36 = vector.broadcast %cst_17 : bf16 to vector<16x1xbf16>
    %37 = vector.extract_strided_slice %20 {offsets = [0, 0], sizes = [16, 127], strides = [1, 1]} : vector<16x128xbf16> to vector<16x127xbf16>
    %38 = tpu.concatenate %36, %37 in 1 : vector<16x1xbf16>, vector<16x127xbf16> -> vector<16x128xbf16>
    %39 = tpu.concatenate %23, %26, %29, %32, %35, %38, %20 in 0 : vector<16x128xbf16>, vector<16x128xbf16>, vector<16x128xbf16>, vector<16x128xbf16>, vector<16x128xbf16>, vector<16x128xbf16>, vector<16x128xbf16> -> vector<112x128xbf16>
    %c0_18 = arith.constant 0 : index
    %c0_19 = arith.constant 0 : index
    %c0_20 = arith.constant 0 : index
    %40 = vector.load %arg5[%c0_18, %c0_19, %c0_20] : memref<3x16x112xbf16, #tpu.memory_space<vmem>>, vector<1x16x112xbf16>
    %41 = vector.shape_cast %40 : vector<1x16x112xbf16> to vector<16x112xbf16>
    %cst_21 = arith.constant dense<0.000000e+00> : vector<16x128xf32>
    %42 = tpu.matmul %41, %39, %cst_21 {dimension_numbers = #tpu.dot_dimension_numbers<[1], [0], [0], [1], [0, 0, 1, 1], [], []>} : vector<16x112xbf16>, vector<112x128xbf16>, vector<16x128xf32> -> vector<16x128xf32>
    %c0_22 = arith.constant 0 : index
    %c0_23 = arith.constant 0 : index
    %c0_24 = arith.constant 0 : index
    %43 = vector.load %arg6[%c0_22, %c0_23, %c0_24] : memref<3x16x1xf32, #tpu.memory_space<vmem>>, vector<1x16x1xf32>
    %44 = vector.shape_cast %43 : vector<1x16x1xf32> to vector<16x1xf32>
    %45 = vector.broadcast %44 : vector<16x1xf32> to vector<16x128xf32>
    %46 = arith.addf %42, %45 : vector<16x128xf32>
    %cst_25 = arith.constant 0.000000e+00 : f32
    %47 = vector.broadcast %cst_25 : f32 to vector<16x128xf32>
    %48 = arith.cmpf ogt, %46, %47 : vector<16x128xf32>
    %cst_26 = arith.constant 0.000000e+00 : f32
    %49 = vector.broadcast %cst_26 : f32 to vector<16x128xf32>
    %50 = arith.minimumf %46, %49 : vector<16x128xf32>
    %51 = math.exp %50 : vector<16x128xf32>
    %cst_27 = arith.constant 1.000000e+00 : f32
    %52 = vector.broadcast %cst_27 : f32 to vector<16x128xf32>
    %53 = arith.subf %51, %52 : vector<16x128xf32>
    %54 = arith.select %48, %46, %53 : vector<16x128xi1>, vector<16x128xf32>
    %c0_28 = arith.constant 0 : index
    %c0_29 = arith.constant 0 : index
    %c0_30 = arith.constant 0 : index
    %55 = vector.load %arg7[%c0_28, %c0_29, %c0_30] : memref<3x16x16xbf16, #tpu.memory_space<vmem>>, vector<1x16x16xbf16>
    %56 = vector.shape_cast %55 : vector<1x16x16xbf16> to vector<16x16xbf16>
    %57 = arith.truncf %54 : vector<16x128xf32> to vector<16x128xbf16>
    %cst_31 = arith.constant dense<0.000000e+00> : vector<16x128xf32>
    %58 = tpu.matmul %56, %57, %cst_31 {dimension_numbers = #tpu.dot_dimension_numbers<[1], [0], [0], [1], [0, 0, 1, 1], [], []>} : vector<16x16xbf16>, vector<16x128xbf16>, vector<16x128xf32> -> vector<16x128xf32>
    %c0_32 = arith.constant 0 : index
    %c0_33 = arith.constant 0 : index
    %c0_34 = arith.constant 0 : index
    %59 = vector.load %arg8[%c0_32, %c0_33, %c0_34] : memref<3x16x1xf32, #tpu.memory_space<vmem>>, vector<1x16x1xf32>
    %60 = vector.shape_cast %59 : vector<1x16x1xf32> to vector<16x1xf32>
    %61 = vector.broadcast %60 : vector<16x1xf32> to vector<16x128xf32>
    %62 = arith.addf %58, %61 : vector<16x128xf32>
    %cst_35 = arith.constant 0.000000e+00 : f32
    %63 = vector.broadcast %cst_35 : f32 to vector<16x128xf32>
    %64 = arith.cmpf ogt, %62, %63 : vector<16x128xf32>
    %cst_36 = arith.constant 0.000000e+00 : f32
    %65 = vector.broadcast %cst_36 : f32 to vector<16x128xf32>
    %66 = arith.minimumf %62, %65 : vector<16x128xf32>
    %67 = math.exp %66 : vector<16x128xf32>
    %cst_37 = arith.constant 1.000000e+00 : f32
    %68 = vector.broadcast %cst_37 : f32 to vector<16x128xf32>
    %69 = arith.subf %67, %68 : vector<16x128xf32>
    %70 = arith.select %64, %62, %69 : vector<16x128xi1>, vector<16x128xf32>
    %71 = arith.addf %19, %70 : vector<16x128xf32>
    %72 = arith.truncf %71 : vector<16x128xf32> to vector<16x128xbf16>
    %cst_38 = arith.constant 0.000000e+00 : bf16
    %73 = vector.broadcast %cst_38 : bf16 to vector<16x18xbf16>
    %74 = vector.extract_strided_slice %72 {offsets = [0, 0], sizes = [16, 110], strides = [1, 1]} : vector<16x128xbf16> to vector<16x110xbf16>
    %75 = tpu.concatenate %73, %74 in 1 : vector<16x18xbf16>, vector<16x110xbf16> -> vector<16x128xbf16>
    %cst_39 = arith.constant 0.000000e+00 : bf16
    %76 = vector.broadcast %cst_39 : bf16 to vector<16x15xbf16>
    %77 = vector.extract_strided_slice %72 {offsets = [0, 0], sizes = [16, 113], strides = [1, 1]} : vector<16x128xbf16> to vector<16x113xbf16>
    %78 = tpu.concatenate %76, %77 in 1 : vector<16x15xbf16>, vector<16x113xbf16> -> vector<16x128xbf16>
    %cst_40 = arith.constant 0.000000e+00 : bf16
    %79 = vector.broadcast %cst_40 : bf16 to vector<16x12xbf16>
    %80 = vector.extract_strided_slice %72 {offsets = [0, 0], sizes = [16, 116], strides = [1, 1]} : vector<16x128xbf16> to vector<16x116xbf16>
    %81 = tpu.concatenate %79, %80 in 1 : vector<16x12xbf16>, vector<16x116xbf16> -> vector<16x128xbf16>
    %cst_41 = arith.constant 0.000000e+00 : bf16
    %82 = vector.broadcast %cst_41 : bf16 to vector<16x9xbf16>
    %83 = vector.extract_strided_slice %72 {offsets = [0, 0], sizes = [16, 119], strides = [1, 1]} : vector<16x128xbf16> to vector<16x119xbf16>
    %84 = tpu.concatenate %82, %83 in 1 : vector<16x9xbf16>, vector<16x119xbf16> -> vector<16x128xbf16>
    %cst_42 = arith.constant 0.000000e+00 : bf16
    %85 = vector.broadcast %cst_42 : bf16 to vector<16x6xbf16>
    %86 = vector.extract_strided_slice %72 {offsets = [0, 0], sizes = [16, 122], strides = [1, 1]} : vector<16x128xbf16> to vector<16x122xbf16>
    %87 = tpu.concatenate %85, %86 in 1 : vector<16x6xbf16>, vector<16x122xbf16> -> vector<16x128xbf16>
    %cst_43 = arith.constant 0.000000e+00 : bf16
    %88 = vector.broadcast %cst_43 : bf16 to vector<16x3xbf16>
    %89 = vector.extract_strided_slice %72 {offsets = [0, 0], sizes = [16, 125], strides = [1, 1]} : vector<16x128xbf16> to vector<16x125xbf16>
    %90 = tpu.concatenate %88, %89 in 1 : vector<16x3xbf16>, vector<16x125xbf16> -> vector<16x128xbf16>
    %91 = tpu.concatenate %75, %78, %81, %84, %87, %90, %72 in 0 : vector<16x128xbf16>, vector<16x128xbf16>, vector<16x128xbf16>, vector<16x128xbf16>, vector<16x128xbf16>, vector<16x128xbf16>, vector<16x128xbf16> -> vector<112x128xbf16>
    %c1 = arith.constant 1 : index
    %c0_44 = arith.constant 0 : index
    %c0_45 = arith.constant 0 : index
    %92 = vector.load %arg5[%c1, %c0_44, %c0_45] : memref<3x16x112xbf16, #tpu.memory_space<vmem>>, vector<1x16x112xbf16>
    %93 = vector.shape_cast %92 : vector<1x16x112xbf16> to vector<16x112xbf16>
    %cst_46 = arith.constant dense<0.000000e+00> : vector<16x128xf32>
    %94 = tpu.matmul %93, %91, %cst_46 {dimension_numbers = #tpu.dot_dimension_numbers<[1], [0], [0], [1], [0, 0, 1, 1], [], []>} : vector<16x112xbf16>, vector<112x128xbf16>, vector<16x128xf32> -> vector<16x128xf32>
    %c1_47 = arith.constant 1 : index
    %c0_48 = arith.constant 0 : index
    %c0_49 = arith.constant 0 : index
    %95 = vector.load %arg6[%c1_47, %c0_48, %c0_49] : memref<3x16x1xf32, #tpu.memory_space<vmem>>, vector<1x16x1xf32>
    %96 = vector.shape_cast %95 : vector<1x16x1xf32> to vector<16x1xf32>
    %97 = vector.broadcast %96 : vector<16x1xf32> to vector<16x128xf32>
    %98 = arith.addf %94, %97 : vector<16x128xf32>
    %cst_50 = arith.constant 0.000000e+00 : f32
    %99 = vector.broadcast %cst_50 : f32 to vector<16x128xf32>
    %100 = arith.cmpf ogt, %98, %99 : vector<16x128xf32>
    %cst_51 = arith.constant 0.000000e+00 : f32
    %101 = vector.broadcast %cst_51 : f32 to vector<16x128xf32>
    %102 = arith.minimumf %98, %101 : vector<16x128xf32>
    %103 = math.exp %102 : vector<16x128xf32>
    %cst_52 = arith.constant 1.000000e+00 : f32
    %104 = vector.broadcast %cst_52 : f32 to vector<16x128xf32>
    %105 = arith.subf %103, %104 : vector<16x128xf32>
    %106 = arith.select %100, %98, %105 : vector<16x128xi1>, vector<16x128xf32>
    %c1_53 = arith.constant 1 : index
    %c0_54 = arith.constant 0 : index
    %c0_55 = arith.constant 0 : index
    %107 = vector.load %arg7[%c1_53, %c0_54, %c0_55] : memref<3x16x16xbf16, #tpu.memory_space<vmem>>, vector<1x16x16xbf16>
    %108 = vector.shape_cast %107 : vector<1x16x16xbf16> to vector<16x16xbf16>
    %109 = arith.truncf %106 : vector<16x128xf32> to vector<16x128xbf16>
    %cst_56 = arith.constant dense<0.000000e+00> : vector<16x128xf32>
    %110 = tpu.matmul %108, %109, %cst_56 {dimension_numbers = #tpu.dot_dimension_numbers<[1], [0], [0], [1], [0, 0, 1, 1], [], []>} : vector<16x16xbf16>, vector<16x128xbf16>, vector<16x128xf32> -> vector<16x128xf32>
    %c1_57 = arith.constant 1 : index
    %c0_58 = arith.constant 0 : index
    %c0_59 = arith.constant 0 : index
    %111 = vector.load %arg8[%c1_57, %c0_58, %c0_59] : memref<3x16x1xf32, #tpu.memory_space<vmem>>, vector<1x16x1xf32>
    %112 = vector.shape_cast %111 : vector<1x16x1xf32> to vector<16x1xf32>
    %113 = vector.broadcast %112 : vector<16x1xf32> to vector<16x128xf32>
    %114 = arith.addf %110, %113 : vector<16x128xf32>
    %cst_60 = arith.constant 0.000000e+00 : f32
    %115 = vector.broadcast %cst_60 : f32 to vector<16x128xf32>
    %116 = arith.cmpf ogt, %114, %115 : vector<16x128xf32>
    %cst_61 = arith.constant 0.000000e+00 : f32
    %117 = vector.broadcast %cst_61 : f32 to vector<16x128xf32>
    %118 = arith.minimumf %114, %117 : vector<16x128xf32>
    %119 = math.exp %118 : vector<16x128xf32>
    %cst_62 = arith.constant 1.000000e+00 : f32
    %120 = vector.broadcast %cst_62 : f32 to vector<16x128xf32>
    %121 = arith.subf %119, %120 : vector<16x128xf32>
    %122 = arith.select %116, %114, %121 : vector<16x128xi1>, vector<16x128xf32>
    %123 = arith.addf %71, %122 : vector<16x128xf32>
    %124 = arith.truncf %123 : vector<16x128xf32> to vector<16x128xbf16>
    %cst_63 = arith.constant 0.000000e+00 : bf16
    %125 = vector.broadcast %cst_63 : bf16 to vector<16x54xbf16>
    %126 = vector.extract_strided_slice %124 {offsets = [0, 0], sizes = [16, 74], strides = [1, 1]} : vector<16x128xbf16> to vector<16x74xbf16>
    %127 = tpu.concatenate %125, %126 in 1 : vector<16x54xbf16>, vector<16x74xbf16> -> vector<16x128xbf16>
    %cst_64 = arith.constant 0.000000e+00 : bf16
    %128 = vector.broadcast %cst_64 : bf16 to vector<16x45xbf16>
    %129 = vector.extract_strided_slice %124 {offsets = [0, 0], sizes = [16, 83], strides = [1, 1]} : vector<16x128xbf16> to vector<16x83xbf16>
    %130 = tpu.concatenate %128, %129 in 1 : vector<16x45xbf16>, vector<16x83xbf16> -> vector<16x128xbf16>
    %cst_65 = arith.constant 0.000000e+00 : bf16
    %131 = vector.broadcast %cst_65 : bf16 to vector<16x36xbf16>
    %132 = vector.extract_strided_slice %124 {offsets = [0, 0], sizes = [16, 92], strides = [1, 1]} : vector<16x128xbf16> to vector<16x92xbf16>
    %133 = tpu.concatenate %131, %132 in 1 : vector<16x36xbf16>, vector<16x92xbf16> -> vector<16x128xbf16>
    %cst_66 = arith.constant 0.000000e+00 : bf16
    %134 = vector.broadcast %cst_66 : bf16 to vector<16x27xbf16>
    %135 = vector.extract_strided_slice %124 {offsets = [0, 0], sizes = [16, 101], strides = [1, 1]} : vector<16x128xbf16> to vector<16x101xbf16>
    %136 = tpu.concatenate %134, %135 in 1 : vector<16x27xbf16>, vector<16x101xbf16> -> vector<16x128xbf16>
    %cst_67 = arith.constant 0.000000e+00 : bf16
    %137 = vector.broadcast %cst_67 : bf16 to vector<16x18xbf16>
    %138 = vector.extract_strided_slice %124 {offsets = [0, 0], sizes = [16, 110], strides = [1, 1]} : vector<16x128xbf16> to vector<16x110xbf16>
    %139 = tpu.concatenate %137, %138 in 1 : vector<16x18xbf16>, vector<16x110xbf16> -> vector<16x128xbf16>
    %cst_68 = arith.constant 0.000000e+00 : bf16
    %140 = vector.broadcast %cst_68 : bf16 to vector<16x9xbf16>
    %141 = vector.extract_strided_slice %124 {offsets = [0, 0], sizes = [16, 119], strides = [1, 1]} : vector<16x128xbf16> to vector<16x119xbf16>
    %142 = tpu.concatenate %140, %141 in 1 : vector<16x9xbf16>, vector<16x119xbf16> -> vector<16x128xbf16>
    %143 = tpu.concatenate %127, %130, %133, %136, %139, %142, %124 in 0 : vector<16x128xbf16>, vector<16x128xbf16>, vector<16x128xbf16>, vector<16x128xbf16>, vector<16x128xbf16>, vector<16x128xbf16>, vector<16x128xbf16> -> vector<112x128xbf16>
    %c2 = arith.constant 2 : index
    %c0_69 = arith.constant 0 : index
    %c0_70 = arith.constant 0 : index
    %144 = vector.load %arg5[%c2, %c0_69, %c0_70] : memref<3x16x112xbf16, #tpu.memory_space<vmem>>, vector<1x16x112xbf16>
    %145 = vector.shape_cast %144 : vector<1x16x112xbf16> to vector<16x112xbf16>
    %cst_71 = arith.constant dense<0.000000e+00> : vector<16x128xf32>
    %146 = tpu.matmul %145, %143, %cst_71 {dimension_numbers = #tpu.dot_dimension_numbers<[1], [0], [0], [1], [0, 0, 1, 1], [], []>} : vector<16x112xbf16>, vector<112x128xbf16>, vector<16x128xf32> -> vector<16x128xf32>
    %c2_72 = arith.constant 2 : index
    %c0_73 = arith.constant 0 : index
    %c0_74 = arith.constant 0 : index
    %147 = vector.load %arg6[%c2_72, %c0_73, %c0_74] : memref<3x16x1xf32, #tpu.memory_space<vmem>>, vector<1x16x1xf32>
    %148 = vector.shape_cast %147 : vector<1x16x1xf32> to vector<16x1xf32>
    %149 = vector.broadcast %148 : vector<16x1xf32> to vector<16x128xf32>
    %150 = arith.addf %146, %149 : vector<16x128xf32>
    %cst_75 = arith.constant 0.000000e+00 : f32
    %151 = vector.broadcast %cst_75 : f32 to vector<16x128xf32>
    %152 = arith.cmpf ogt, %150, %151 : vector<16x128xf32>
    %cst_76 = arith.constant 0.000000e+00 : f32
    %153 = vector.broadcast %cst_76 : f32 to vector<16x128xf32>
    %154 = arith.minimumf %150, %153 : vector<16x128xf32>
    %155 = math.exp %154 : vector<16x128xf32>
    %cst_77 = arith.constant 1.000000e+00 : f32
    %156 = vector.broadcast %cst_77 : f32 to vector<16x128xf32>
    %157 = arith.subf %155, %156 : vector<16x128xf32>
    %158 = arith.select %152, %150, %157 : vector<16x128xi1>, vector<16x128xf32>
    %c2_78 = arith.constant 2 : index
    %c0_79 = arith.constant 0 : index
    %c0_80 = arith.constant 0 : index
    %159 = vector.load %arg7[%c2_78, %c0_79, %c0_80] : memref<3x16x16xbf16, #tpu.memory_space<vmem>>, vector<1x16x16xbf16>
    %160 = vector.shape_cast %159 : vector<1x16x16xbf16> to vector<16x16xbf16>
    %161 = arith.truncf %158 : vector<16x128xf32> to vector<16x128xbf16>
    %cst_81 = arith.constant dense<0.000000e+00> : vector<16x128xf32>
    %162 = tpu.matmul %160, %161, %cst_81 {dimension_numbers = #tpu.dot_dimension_numbers<[1], [0], [0], [1], [0, 0, 1, 1], [], []>} : vector<16x16xbf16>, vector<16x128xbf16>, vector<16x128xf32> -> vector<16x128xf32>
    %c2_82 = arith.constant 2 : index
    %c0_83 = arith.constant 0 : index
    %c0_84 = arith.constant 0 : index
    %163 = vector.load %arg8[%c2_82, %c0_83, %c0_84] : memref<3x16x1xf32, #tpu.memory_space<vmem>>, vector<1x16x1xf32>
    %164 = vector.shape_cast %163 : vector<1x16x1xf32> to vector<16x1xf32>
    %165 = vector.broadcast %164 : vector<16x1xf32> to vector<16x128xf32>
    %166 = arith.addf %162, %165 : vector<16x128xf32>
    %cst_85 = arith.constant 0.000000e+00 : f32
    %167 = vector.broadcast %cst_85 : f32 to vector<16x128xf32>
    %168 = arith.cmpf ogt, %166, %167 : vector<16x128xf32>
    %cst_86 = arith.constant 0.000000e+00 : f32
    %169 = vector.broadcast %cst_86 : f32 to vector<16x128xf32>
    %170 = arith.minimumf %166, %169 : vector<16x128xf32>
    %171 = math.exp %170 : vector<16x128xf32>
    %cst_87 = arith.constant 1.000000e+00 : f32
    %172 = vector.broadcast %cst_87 : f32 to vector<16x128xf32>
    %173 = arith.subf %171, %172 : vector<16x128xf32>
    %174 = arith.select %168, %166, %173 : vector<16x128xi1>, vector<16x128xf32>
    %175 = arith.addf %123, %174 : vector<16x128xf32>
    %c0_88 = arith.constant 0 : index
    %c0_89 = arith.constant 0 : index
    %c0_90 = arith.constant 0 : index
    %176 = vector.load %arg9[%c0_88, %c0_89, %c0_90] : memref<1x16x128xf32, #tpu.memory_space<vmem>>, vector<1x16x128xf32>
    %177 = vector.shape_cast %176 : vector<1x16x128xf32> to vector<16x128xf32>
    %178 = vector.shape_cast %175 : vector<16x128xf32> to vector<1x16x128xf32>
    tpu.vector_store %arg9[%c0_88, %c0_89, %c0_90], %178 {strides = array<i32>} : memref<1x16x128xf32, #tpu.memory_space<vmem>>, vector<1x16x128xf32>,
    return
  }
  func.func @transform_0(%arg0: i32) -> (i32, i32, i32) {
    %c0_i32 = arith.constant 0 : i32
    %c0_i32_0 = arith.constant 0 : i32
    %c0_i32_1 = arith.constant 0 : i32
    return %arg0, %c0_i32, %c0_i32_0 : i32, i32, i32
  }
  func.func @transform_1(%arg0: i32) -> (i32, i32) {
    %c0_i32 = arith.constant 0 : i32
    %c0_i32_0 = arith.constant 0 : i32
    %c0_i32_1 = arith.constant 0 : i32
    return %c0_i32, %c0_i32_0 : i32, i32
  }
  func.func @transform_2(%arg0: i32) -> (i32, i32) {
    %c0_i32 = arith.constant 0 : i32
    %c0_i32_0 = arith.constant 0 : i32
    %c0_i32_1 = arith.constant 0 : i32
    return %c0_i32, %c0_i32_0 : i32, i32
  }
  func.func @transform_3(%arg0: i32) -> (i32, i32) {
    %c0_i32 = arith.constant 0 : i32
    %c0_i32_0 = arith.constant 0 : i32
    %c0_i32_1 = arith.constant 0 : i32
    return %c0_i32, %c0_i32_0 : i32, i32
  }
  func.func @transform_4(%arg0: i32) -> (i32, i32, i32) {
    %c0_i32 = arith.constant 0 : i32
    %c0_i32_0 = arith.constant 0 : i32
    %c0_i32_1 = arith.constant 0 : i32
    %c0_i32_2 = arith.constant 0 : i32
    return %c0_i32, %c0_i32_0, %c0_i32_1 : i32, i32, i32
  }
  func.func @transform_5(%arg0: i32) -> (i32, i32, i32) {
    %c0_i32 = arith.constant 0 : i32
    %c0_i32_0 = arith.constant 0 : i32
    %c0_i32_1 = arith.constant 0 : i32
    %c0_i32_2 = arith.constant 0 : i32
    return %c0_i32, %c0_i32_0, %c0_i32_1 : i32, i32, i32
  }
  func.func @transform_6(%arg0: i32) -> (i32, i32, i32) {
    %c0_i32 = arith.constant 0 : i32
    %c0_i32_0 = arith.constant 0 : i32
    %c0_i32_1 = arith.constant 0 : i32
    %c0_i32_2 = arith.constant 0 : i32
    return %c0_i32, %c0_i32_0, %c0_i32_1 : i32, i32, i32
  }
  func.func @transform_7(%arg0: i32) -> (i32, i32, i32) {
    %c0_i32 = arith.constant 0 : i32
    %c0_i32_0 = arith.constant 0 : i32
    %c0_i32_1 = arith.constant 0 : i32
    %c0_i32_2 = arith.constant 0 : i32
    return %c0_i32, %c0_i32_0, %c0_i32_1 : i32, i32, i32
  }
  func.func @transform_8(%arg0: i32) -> (i32, i32, i32) {
    %c0_i32 = arith.constant 0 : i32
    %c0_i32_0 = arith.constant 0 : i32
    %c0_i32_1 = arith.constant 0 : i32
    return %arg0, %c0_i32, %c0_i32_0 : i32, i32, i32
  }
}

</mosaic_0001>

<bundles_post_ra>
// kernel: forward.1
= control target key start
LH: loop header
LB: loop body
LE: loop exit
PB: predicated region body
PF: predicated region fallthrough
CT: control target
= control target key end

     0   :  { %13 = vsyncpa [#allocation3], 0  ;;  %s1972_s0 = inlined_call_operand.vmem [shape: bf16[2,32,64], index: 0, kind: input, shape index: {}]   ;;  %s1973_s1 = inlined_call_operand.vmem [shape: bf16[16,128], index: 1, kind: input, shape index: {}]   ;;  %s1974_s2 = inlined_call_operand.vmem [shape: bf16[64,128], index: 2, kind: input, shape index: {}]   ;;  %s1975_s3 = inlined_call_operand.vmem [shape: f32[16,1], index: 3, kind: input, shape index: {}]   ;;  %s1976_s4 = inlined_call_operand.vmem [shape: bf16[3,16,112], index: 4, kind: input, shape index: {}]   ;;  %s1977_s5 = inlined_call_operand.vmem [shape: f32[3,16,1], index: 5, kind: input, shape index: {}]   ;;  %s1978_s6 = inlined_call_operand.vmem [shape: bf16[3,16,16], index: 6, kind: input, shape index: {}]   ;;  %s1979_s7 = inlined_call_operand.vmem [shape: f32[3,16,1], index: 7, kind: input, shape index: {}]   ;;  %s1980_s8 = inlined_call_operand.hbm [shape: f32[2,16,128], index: 8, kind: output, shape index: {}]  }
   0x1   :  { %15 = vsyncpa [#allocation3 + $0x1], 0  ;;  %s1646_s27 = smov 0   ;;  %s1648_s28 = smov 0  }
   0x2   :  { %s1650_s29 = smov 0   ;;  %s1652_s30 = smov 0  }
   0x3 LB: > { %s1667_s9 = sadd.s32 4294967295, %s1579_s30   ;;  %s1160_s10 = sadd.s32 4294967294, %s1579_s30   ;;  %s1579_s30 = sphi %s1652_s30, %s1998_s30   ;;  %s1575_s29 = sphi %s1650_s29, %s1997_s29   ;;  %s1571_s28 = sphi %s1648_s28, %s1996_s28   ;;  %s1567_s27 = sphi %s1646_s27, %s1995_s27  }
   0x4   : > { %s1671_s11 = sadd.s32 1, %s1579_s30   ;;  %s201_s12 = sadd.s32 1, %s1575_s29 }
   0x5   : > { %s198_s13 = ssub.s32 %s1579_s30, %s1671_s11  ;;  %p211_p0 = scmp.ne.s32.totalorder %s1575_s29, %s1571_s28 }
   0x6   : > { %p199_p1 = scmp.eq.s32.totalorder %s198_s13, 0  ;;  %p212_p2 = scmp.eq.s32.totalorder %s1667_s9, 1 }
   0x7   : > { %p217_p3 = scmp.ne.s32.totalorder %s1571_s28, %s1567_s27  ;;  %p218_p4 = scmp.eq.s32.totalorder %s1160_s10, 1 }
   0x8   : > { %s1682_s14 = scalar_select %p199_p1, %s1575_s29, %s201_s12  }
   0x9   : > { %p1684_p5 = por %p212_p2, %p211_p0  ;;  %p1688_p6 = por %p218_p4, %p217_p3 }
   0xa   : > { %p1163_p7 = scmp.ge.s32.totalorder %s1579_s30, 1  ;;  %p265_p8 = scmp.lt.s32.totalorder %s1579_s30, 3 }
   0xc   : > { %p266_p9 = pnand %p1163_p7, %p265_p8 }
   0xd   : > { %v1480_v0 = vld [vmem:[%s1974_s2] sm:$0xff] (!%p266_p9)   ;;  %p299_p10 = scmp.lt.s32.totalorder (!%p266_p9), %s1667_s9, 1  ;;  %v1481_v1 = vld [vmem:[%s1974_s2 + $0x8] sm:$0xff] (!%p266_p9)   ;;  %vm351_vm0 = vcmask (!%p266_p9), 523264   ;;  %v1482_v2 = vld [vmem:[%s1974_s2 + $0x10] sm:$0xff] (!%p266_p9)   ;;  %v1581_v6 = vmov (!%p266_p9), 0.0  }
   0xe   : > { %269 = sbr.rel (%p266_p9) target bundleno = 2473 (0x9a9), region = 52  ;;  %1316 = vmatprep.subr.bf16.mxu0 (!%p266_p9), %v1480_v0  ;;  %v1483_v4 = vld [vmem:[%s1974_s2 + $0x18] sm:$0xff] (!%p266_p9)   ;;  %1328 = vmatprep.subr.bf16.mxu1 (!%p266_p9), %v1581_v6  ;;  %s1582_s17 = smov (!%p266_p9), 2   ;;  %vm1585_vm1 = vmmov (!%p266_p9), 0   ;;  %v447_v13 = vld [vmem:[%s1975_s3] sm:$0xff] (!%p266_p9)  ;;  %v448_v14 = vld [vmem:[%s1975_s3 + $0x8] sm:$0xff] (!%p266_p9) }
   0xf   : > { %1317 = vmatpush3.bf16.msra.mxu0 (!%p266_p9), %v1480_v0  ;;  %s1583_s18 = smov (!%p266_p9), 1   ;;  %s1584_s19 = smov (!%p266_p9), 3   ;;  %1344 = vmatprep.mubr.msk.bf16.mxu1 (!%p266_p9), %vm1585_vm1, %v1581_v6  ;;  %v1586_v15 = vmov (!%p266_p9), 0   ;;  %vm415_vm2 = vcmask (!%p266_p9), 7168   ;;  %vm427_vm4 = vcmask (!%p266_p9), 15360   ;;  %vm438_vm6 = vcmask (!%p266_p9), 23552  }
  0x10   : > { %1318 = vmatprep.subr.bf16.mxu0 (!%p266_p9), %v1481_v1  ;;  %1478 = vset.pattern.permute.xlu0 (!%p266_p9), %v1586_v15  ;;  %vm1731_vm3 = vmneg (!%p266_p9), %vm415_vm2  ;;  %v1486_v25 = vld [vmem:[%s1973_s1] sm:$0xff] (!%p266_p9)   ;;  %s1587_s26 = smov (!%p266_p9), 5   ;;  %s1589_s12 = smov (!%p266_p9), 4   ;;  %v544_v35 = vld [vmem:[%s1977_s5 + $0x8] sm:$0xff] (!%p266_p9)  ;;  %vm510_vm8 = vcmask (!%p266_p9), 48128   ;;  %vm516_vm10 = vcmask (!%p266_p9), 39936  }
  0x11   : > { %1479 = vset.pattern.permute.xlu1 (!%p266_p9), %v1586_v15  ;;  %vm1741_vm5 = vmneg (!%p266_p9), %vm427_vm4  ;;  %v543_v36 = vld [vmem:[%s1977_s5] sm:$0xff] (!%p266_p9)  ;;  %v621_v37 = vld [vmem:[%s1979_s7 + $0x8] sm:$0xff] (!%p266_p9)  ;;  %vm522_vm12 = vcmask (!%p266_p9), 31744   ;;  %vm560_vm14 = vcmask (!%p266_p9), 916480   ;;  %vm637_vm2 = vcmask (!%p266_p9), 130048   ;;  %s1590_s20 = smov (!%p266_p9), 15  }
  0x12   : > { %vm1751_vm7 = vmneg (!%p266_p9), %vm438_vm6  ;;  %v620_v38 = vld [vmem:[%s1979_s7] sm:$0xff] (!%p266_p9)  ;;  %s1592_s22 = smov (!%p266_p9), 9   ;;  %s1593_s23 = smov (!%p266_p9), 12  }
  0x13   : > { %1319 = vmatpush3.bf16.msra.mxu0 (!%p266_p9), %v1481_v1  ;;  %vm1788_vm9 = vmneg (!%p266_p9), %vm510_vm8  ;;  %v1487_v46 = vld [vmem:[%s1976_s4] sm:$0xff] (!%p266_p9)   ;;  %vm706_vm8 = vcmask (!%p266_p9), 121856   ;;  %s1594_s25 = smov (!%p266_p9), 45   ;;  %s1270_s13 = sshll.u32 (!%p266_p9), %s1667_s9, 8 }
  0x14   : > { %1320 = vmatprep.subr.bf16.mxu0 (!%p266_p9), %v1482_v2  ;;  %vm1191_vm11 = vmneg (!%p266_p9), %vm516_vm10 }
  0x15   : > { %s300_s21 = scalar_select %p299_p10, %s1667_s9, 1  ;;  %vm1193_vm13 = vmneg %vm522_vm12 }
  0x16   : > { %vm1215_vm10 = vmneg %vm706_vm8 }
  0x17   : > { %s1269_s24 = sshll.u32 %s300_s21, 4  ;;  %1321 = vmatpush3.bf16.msra.mxu0 %v1482_v2  ;;  %v1488_v2 = vld [vmem:[%s1978_s6] sm:$0xff]   ;;  %s1591_s21 = smov 18  }
  0x18   : > { %s303_s10 = scalar_lea.vmem %s1972_s0, %s1269_s24  ;;  %1322 = vmatprep.subr.bf16.mxu0 %v1483_v4  ;;  %s1926_s24 = scalar_lea.hbm %s1980_s8, %s1270_s13 }
  0x19   : > { %v1484_v3 = vld [vmem:[%s303_s10] sm:$0xff]   ;;  %v1485_v5 = vld [vmem:[%s303_s10 + $0x8] sm:$0xff]   ;;  %s1588_s10 = smov 6  }
  0x1a   : > { %1324 = vmatprep.mubr.msk.bf16.mxu0 %vm351_vm0, %v1484_v3 }
  0x1b   : > { %1323 = vmatpush3.bf16.msra.mxu0 %v1483_v4 }
  0x1c   : > { %1348 = vmatprep.subr.bf16.mxu0 %v1581_v6 }
  0x1e   : > { %1325 = vmatmul.mubr.msk.bf16.vlgmr.msra.gmra.mrb[0].mxu0 %vm351_vm0, %v1485_v5 }
  0x1f   : > { %1362 = vmatprep.mubr.msk.bf16.mxu0 %vm1585_vm1, %v1581_v6 }
  0xf1   : > { %v1326_v7 = vpop.f32.mrb[0].mxu0 }
  0xf2   : > { %v392_v8 = vpop.f32.mrb[1].mxu0 }
  0xf3   : > { %v1327_v9 = vpop.f32.mrb[2].mxu0 }
  0xf4   : > { %v408_v10 = vpack.c.bf16 %v1327_v9, %v1326_v7  ;;  %v395_v11 = vpop.f32.mrb[3].mxu0 }
  0xf5   : > { %v407_v12 = vpack.c.bf16 %v395_v11, %v392_v8 }
  0xf7   : > { %423 = vrot.lane.b32.xlu1 %v407_v12, %s1582_s17  ;;  %411 = vrot.lane.b32.xlu0 %v407_v12, %s1583_s18 }
  0xf8   : > { %1329 = vmatpush3.bf16.msra.mxu1 %v407_v12 }
  0xf9   : > { %1330 = vmatprep.subr.bf16.mxu1 %v1581_v6 }
  0xfb   : > { %425 = vrot.lane.b32.xlu1 %v408_v10, %s1582_s17  ;;  %413 = vrot.lane.b32.xlu0 %v408_v10, %s1583_s18 }
  0xfc   : > { %1331 = vmatpush3.bf16.msra.mxu1 %v408_v10 }
  0xfd   : > { %1332 = vmatprep.subr.bf16.mxu1 %v1581_v6 }
  0xff   : > { %436 = vrot.lane.b32.xlu1 %v408_v10, %s1584_s19  ;;  %434 = vrot.lane.b32.xlu0 %v407_v12, %s1584_s19 }
 0x103   : > { %451 = vperm.xlu0 %1478, %v447_v13   ;;  %456 = vperm.xlu1 %1479, %v448_v14  }
 0x169   : > { %v412_v17 = vpop.permute.xlu0 %411  ;;  %v424_v19 = vpop.permute.xlu1 %423 }
 0x16a   : > { %1333 = vmatpush3.bf16.msk.msra.mxu1 %vm1731_vm3, %v412_v17 }
 0x16b   : > { %1334 = vmatprep.subr.bf16.mxu1 %v1581_v6 }
 0x16d   : > { %v414_v18 = vpop.permute.xlu0 %413  ;;  %v426_v21 = vpop.permute.xlu1 %425 }
 0x16e   : > { %1335 = vmatpush3.bf16.msk.msra.mxu1 %vm1731_vm3, %v414_v18 }
 0x16f   : > { %1336 = vmatprep.subr.bf16.mxu1 %v1581_v6 }
 0x171   : > { %v435_v23 = vpop.permute.xlu0 %434  ;;  %v437_v24 = vpop.permute.xlu1 %436 }
 0x172   : > { %1337 = vmatpush3.bf16.msk.msra.mxu1 %vm1741_vm5, %v424_v19 }
 0x173   : > { %1338 = vmatprep.subr.bf16.mxu1 %v1581_v6 }
 0x176   : > { %1339 = vmatpush3.bf16.msk.msra.mxu1 %vm1741_vm5, %v426_v21 }
 0x177   : > { %1340 = vmatprep.subr.bf16.mxu1 %v1581_v6 }
 0x17a   : > { %1341 = vmatpush3.bf16.msk.msra.mxu1 %vm1751_vm7, %v435_v23 }
 0x17b   : > { %1342 = vmatprep.subr.bf16.mxu1 %v1581_v6 }
 0x17e   : > { %1343 = vmatpush3.bf16.msk.msra.mxu1 %vm1751_vm7, %v437_v24 }
 0x17f   : > { %1366 = vmatprep.subr.bf16.mxu1 %v1581_v6 }
 0x181   : > { %1345 = vmatmul.mubr.bf16.vlgmr.msra.gmra.mrb[0].mxu1 %v1486_v25 }
 0x182   : > { %1368 = vmatprep.mubr.msk.bf16.mxu1 %vm1585_vm1, %v1581_v6  ;;  %v452_v26 = vpop.permute.xlu0 %451  ;;  %v457_v28 = vpop.permute.xlu1 %456 }
 0x254   : > { %v499_v27 = vpop.f32.mrb[0].mxu1 }
 0x255   : > { %v1346_v29 = vpop.f32.mrb[1].mxu1  ;;  %v1766_v31 = vadd.f32 %v499_v27, %v452_v26  ;;  %v1211_v26 = vld [vmem:[%s1977_s5 + $0x18] sm:$0xff]  ;;  %v1210_v27 = vld [vmem:[%s1977_s5 + $0x10] sm:$0xff] }
 0x256   : > { %v502_v30 = vpop.f32.mrb[2].mxu1  ;;  %v1230_v29 = vld [vmem:[%s1979_s7 + $0x10] sm:$0xff] }
 0x257   : > { %v1768_v32 = vadd.f32 %v502_v30, %v457_v28  ;;  %v1347_v33 = vpop.f32.mrb[3].mxu1  ;;  %v1231_v28 = vld [vmem:[%s1979_s7 + $0x18] sm:$0xff] }
 0x259   : > { %v506_v34 = vpack.c.bf16 %v1768_v32, %v1766_v31 }
 0x25b   : > { %514 = vrot.lane.b32.xlu0 %v506_v34, %s1587_s26  ;;  %508 = vrot.lane.b32.xlu1 %v506_v34, %s1588_s10  ;;  %s1595_s26 = smov 54  }
 0x25f   : > { %526 = vrot.lane.b32.xlu0 %v506_v34, %s1584_s19  ;;  %520 = vrot.lane.b32.xlu1 %v506_v34, %s1589_s12 }
 0x263   : > { %536 = vrot.lane.b32.xlu0 %v506_v34, %s1583_s18  ;;  %531 = vrot.lane.b32.xlu1 %v506_v34, %s1582_s17  ;;  %s1596_s17 = smov 27   ;;  %s1597_s18 = smov 36  }
 0x267   : > { %552 = vperm.xlu0 %1478, %v544_v35   ;;  %547 = vperm.xlu1 %1479, %v543_v36  }
 0x26b   : > { %629 = vperm.xlu0 %1478, %v621_v37   ;;  %624 = vperm.xlu1 %1479, %v620_v38   ;;  %v1489_v38 = vld [vmem:[%s1976_s4 + $0x8] sm:$0xff]  }
 0x2cd   : > { %v509_v40 = vpop.permute.xlu1 %508  ;;  %v515_v41 = vpop.permute.xlu0 %514 }
 0x2ce   : > { %1349 = vmatpush3.bf16.msk.msra.mxu0 %vm1788_vm9, %v509_v40 }
 0x2cf   : > { %1350 = vmatprep.subr.bf16.mxu0 %v1581_v6 }
 0x2d1   : > { %v521_v42 = vpop.permute.xlu1 %520  ;;  %v527_v43 = vpop.permute.xlu0 %526 }
 0x2d2   : > { %1351 = vmatpush3.bf16.msk.msra.mxu0 %vm1191_vm11, %v515_v41  ;;  %vm712_vm11 = vcmask 97280  }
 0x2d3   : > { %1352 = vmatprep.subr.bf16.mxu0 %v1581_v6  ;;  %vm1217_vm12 = vmneg %vm712_vm11 }
 0x2d5   : > { %v532_v44 = vpop.permute.xlu1 %531  ;;  %v537_v45 = vpop.permute.xlu0 %536 }
 0x2d6   : > { %1353 = vmatpush3.bf16.msk.msra.mxu0 %vm1193_vm13, %v521_v42  ;;  %vm718_vm13 = vcmask 72704  }
 0x2d7   : > { %1354 = vmatprep.subr.bf16.mxu0 %v1581_v6 }
 0x2da   : > { %1355 = vmatpush3.bf16.msk.msra.mxu0 %vm1751_vm7, %v527_v43 }
 0x2db   : > { %1356 = vmatprep.subr.bf16.mxu0 %v1581_v6 }
 0x2de   : > { %1357 = vmatpush3.bf16.msk.msra.mxu0 %vm1741_vm5, %v532_v44  ;;  %vm700_vm5 = vcmask 146432  }
 0x2df   : > { %1358 = vmatprep.subr.bf16.mxu0 %v1581_v6  ;;  %vm1844_vm6 = vmneg %vm700_vm5  ;;  %vm899_vm5 = vcmask 367616  }
 0x2e0   : > { %vm1243_vm8 = vmneg %vm899_vm5 }
 0x2e2   : > { %1359 = vmatpush3.bf16.msk.msra.mxu0 %vm1731_vm3, %v537_v45 }
 0x2e3   : > { %1360 = vmatprep.subr.bf16.mxu0 %v1581_v6 }
 0x2e6   : > { %1361 = vmatpush3.bf16.msra.mxu0 %v506_v34  ;;  %v548_v47 = vpop.permute.xlu1 %547  ;;  %v553_v51 = vpop.permute.xlu0 %552 }
 0x2e7   : > { %1390 = vmatprep.subr.bf16.mxu0 %v1581_v6 }
 0x2e9   : > { %1363 = vmatmul.mubr.msk.bf16.vlgmr.msra.gmra.mrb[4].mxu0 %vm560_vm14, %v1487_v46 }
 0x2ea   : > { %1392 = vmatprep.mubr.msk.bf16.mxu0 %vm1585_vm1, %v1581_v6  ;;  %v625_v3 = vpop.permute.xlu1 %624  ;;  %v630_v8 = vpop.permute.xlu0 %629 }
 0x3bc   : > { %v598_v48 = vpop.f32.mrb[4].mxu0 }
 0x3bd   : > { %v599_v49 = vadd.f32 %v598_v48, %v548_v47  ;;  %v1364_v50 = vpop.f32.mrb[5].mxu0 }
 0x3be   : > { %v601_v52 = vpop.f32.mrb[6].mxu0 }
 0x3bf   : > { %v607_v53 = vmin.f32 %v599_v49, 0.0  ;;  %v602_v54 = vadd.f32 %v601_v52, %v553_v51  ;;  %v1365_v55 = vpop.f32.mrb[7].mxu0  ;;  %vm605_vm15 = vcmp.gt.f32.partialorder %v599_v49, 0.0 }
 0x3c1   : > { %v609_v56 = vmul.f32 1.442695, %v607_v53  ;;  %v608_v57 = vmin.f32 %v602_v54, 0.0  ;;  %vm606_vm0 = vcmp.gt.f32.partialorder %v602_v54, 0.0 }
 0x3c3   : > { %1493 = vpow2.f32 %v609_v56  ;;  %v611_v58 = vmul.f32 1.442695, %v608_v57  ;;  %v1490_v57 = vld [vmem:[%s1978_s6 + $0x8] sm:$0xff]  }
 0x3c5   : > { %1495 = vpow2.f32 %v611_v58 }
 0x3cd   : > { %v1494_v59 = vpop.eup %1493 }
 0x3ce   : > { %v1202_v60 = vadd.f32 -1.0, %v1494_v59 }
 0x3cf   : > { %v1496_v61 = vpop.eup %1495 }
 0x3d0   : > { %v1203_v62 = vadd.f32 -1.0, %v1496_v61  ;;  %v615_v63 = vsel %vm605_vm15, %v599_v49, %v1202_v60  ;;  %vm1853_vm15 = vmneg %vm718_vm13 }
 0x3d2   : > { %v616_v0 = vsel %vm606_vm0, %v602_v54, %v1203_v62 }
 0x3d3   : > { %v619_v1 = vpack.c.bf16 %v616_v0, %v615_v63 }
 0x3d5   : > { %1367 = vmatpush3.bf16.msra.mxu1 %v619_v1 }
 0x3d6   : > { %1372 = vmatprep.subr.bf16.mxu1 %v1581_v6 }
 0x3d8   : > { %1369 = vmatmul.mubr.msk.bf16.vlgmr.msra.gmra.mrb[4].mxu1 %vm637_vm2, %v1488_v2 }
 0x3d9   : > { %1386 = vmatprep.mubr.msk.bf16.mxu1 %vm1585_vm1, %v1581_v6 }
 0x4ab   : > { %v675_v4 = vpop.f32.mrb[4].mxu1 }
 0x4ac   : > { %v676_v5 = vadd.f32 %v675_v4, %v625_v3  ;;  %v1370_v7 = vpop.f32.mrb[5].mxu1 }
 0x4ad   : > { %v678_v9 = vpop.f32.mrb[6].mxu1 }
 0x4ae   : > { %v684_v10 = vmin.f32 %v676_v5, 0.0  ;;  %v679_v11 = vadd.f32 %v678_v9, %v630_v8  ;;  %v1371_v12 = vpop.f32.mrb[7].mxu1  ;;  %vm682_vm3 = vcmp.gt.f32.partialorder %v676_v5, 0.0 }
 0x4b0   : > { %v686_v13 = vmul.f32 1.442695, %v684_v10  ;;  %v685_v14 = vmin.f32 %v679_v11, 0.0  ;;  %vm683_vm4 = vcmp.gt.f32.partialorder %v679_v11, 0.0 }
 0x4b2   : > { %1497 = vpow2.f32 %v686_v13  ;;  %v688_v15 = vmul.f32 1.442695, %v685_v14 }
 0x4b4   : > { %1499 = vpow2.f32 %v688_v15 }
 0x4bc   : > { %v1498_v16 = vpop.eup %1497 }
 0x4bd   : > { %v1206_v17 = vadd.f32 -1.0, %v1498_v16  ;;  %v1239_v16 = vld [vmem:[%s1977_s5 + $0x28] sm:$0xff] }
 0x4be   : > { %v1500_v18 = vpop.eup %1499 }
 0x4bf   : > { %v692_v19 = vsel %vm682_vm3, %v676_v5, %v1206_v17  ;;  %v1207_v20 = vadd.f32 -1.0, %v1500_v18  ;;  %v1238_v17 = vld [vmem:[%s1977_s5 + $0x20] sm:$0xff]  ;;  %v1259_v18 = vld [vmem:[%s1979_s7 + $0x28] sm:$0xff]  ;;  %vm893_vm3 = vcmask 441344  }
 0x4c0   : > { %v1821_v23 = vadd.f32 %v692_v19, %v1766_v31  ;;  %v1258_v19 = vld [vmem:[%s1979_s7 + $0x20] sm:$0xff] }
 0x4c1   : > { %v693_v21 = vsel %vm683_vm4, %v679_v11, %v1207_v20  ;;  %vm1241_vm4 = vmneg %vm893_vm3 }
 0x4c2   : > { %v1824_v24 = vadd.f32 %v693_v21, %v1768_v32 }
 0x4c4   : > { %v696_v25 = vpack.c.bf16 %v1824_v24, %v1821_v23 }
 0x4c6   : > { %704 = vrot.lane.b32.xlu0 %v696_v25, %s1590_s20  ;;  %698 = vrot.lane.b32.xlu1 %v696_v25, %s1591_s21 }
 0x4ca   : > { %716 = vrot.lane.b32.xlu0 %v696_v25, %s1592_s22  ;;  %710 = vrot.lane.b32.xlu1 %v696_v25, %s1593_s23 }
 0x4ce   : > { %727 = vrot.lane.b32.xlu0 %v696_v25, %s1584_s19  ;;  %722 = vrot.lane.b32.xlu1 %v696_v25, %s1588_s10 }
 0x4d2   : > { %745 = vperm.xlu0 %1478, %v1211_v26   ;;  %740 = vperm.xlu1 %1479, %v1210_v27   ;;  %v1491_v27 = vld [vmem:[%s1976_s4 + $0x10] sm:$0xff]  }
 0x4d6   : > { %823 = vperm.xlu0 %1478, %v1231_v28   ;;  %818 = vperm.xlu1 %1479, %v1230_v29  }
 0x538   : > { %v699_v31 = vpop.permute.xlu1 %698  ;;  %v705_v32 = vpop.permute.xlu0 %704 }
 0x539   : > { %1373 = vmatpush3.bf16.msk.msra.mxu1 %vm1844_vm6, %v699_v31 }
 0x53a   : > { %1374 = vmatprep.subr.bf16.mxu1 %v1581_v6 }
 0x53c   : > { %v711_v33 = vpop.permute.xlu1 %710  ;;  %v717_v35 = vpop.permute.xlu0 %716 }
 0x53d   : > { %1375 = vmatpush3.bf16.msk.msra.mxu1 %vm1215_vm10, %v705_v32  ;;  %vm905_vm10 = vcmask 293888  }
 0x53e   : > { %1376 = vmatprep.subr.bf16.mxu1 %v1581_v6  ;;  %vm1245_vm11 = vmneg %vm905_vm10 }
 0x540   : > { %v723_v36 = vpop.permute.xlu1 %722  ;;  %v728_v37 = vpop.permute.xlu0 %727 }
 0x541   : > { %1377 = vmatpush3.bf16.msk.msra.mxu1 %vm1217_vm12, %v711_v33  ;;  %vm911_vm12 = vcmask 220160  }
 0x542   : > { %1378 = vmatprep.subr.bf16.mxu1 %v1581_v6  ;;  %vm1247_vm13 = vmneg %vm911_vm12 }
 0x545   : > { %1379 = vmatpush3.bf16.msk.msra.mxu1 %vm1853_vm15, %v717_v35 }
 0x546   : > { %1380 = vmatprep.subr.bf16.mxu1 %v1581_v6 }
 0x549   : > { %1381 = vmatpush3.bf16.msk.msra.mxu1 %vm1788_vm9, %v723_v36 }
 0x54a   : > { %1382 = vmatprep.subr.bf16.mxu1 %v1581_v6 }
 0x54d   : > { %1383 = vmatpush3.bf16.msk.msra.mxu1 %vm1751_vm7, %v728_v37 }
 0x54e   : > { %1384 = vmatprep.subr.bf16.mxu1 %v1581_v6 }
 0x551   : > { %1385 = vmatpush3.bf16.msra.mxu1 %v696_v25  ;;  %v741_v39 = vpop.permute.xlu1 %740  ;;  %v746_v22 = vpop.permute.xlu0 %745 }
 0x552   : > { %1414 = vmatprep.subr.bf16.mxu1 %v1581_v6 }
 0x554   : > { %1387 = vmatmul.mubr.msk.bf16.vlgmr.msra.gmra.mrb[8].mxu1 %vm560_vm14, %v1489_v38 }
 0x555   : > { %1416 = vmatprep.mubr.msk.bf16.mxu1 %vm1585_vm1, %v1581_v6  ;;  %v819_v58 = vpop.permute.xlu1 %818  ;;  %v824_v62 = vpop.permute.xlu0 %823 }
 0x627   : > { %v790_v40 = vpop.f32.mrb[8].mxu1 }
 0x628   : > { %v791_v41 = vadd.f32 %v790_v40, %v741_v39  ;;  %v1388_v42 = vpop.f32.mrb[9].mxu1 }
 0x629   : > { %v793_v43 = vpop.f32.mrb[10].mxu1 }
 0x62a   : > { %v799_v44 = vmin.f32 %v791_v41, 0.0  ;;  %v794_v45 = vadd.f32 %v793_v43, %v746_v22  ;;  %v1389_v46 = vpop.f32.mrb[11].mxu1  ;;  %vm797_vm7 = vcmp.gt.f32.partialorder %v791_v41, 0.0 }
 0x62c   : > { %v801_v47 = vmul.f32 1.442695, %v799_v44  ;;  %v800_v48 = vmin.f32 %v794_v45, 0.0  ;;  %vm798_vm9 = vcmp.gt.f32.partialorder %v794_v45, 0.0 }
 0x62e   : > { %1501 = vpow2.f32 %v801_v47  ;;  %v803_v49 = vmul.f32 1.442695, %v800_v48 }
 0x630   : > { %1503 = vpow2.f32 %v803_v49 }
 0x638   : > { %v1502_v50 = vpop.eup %1501 }
 0x639   : > { %v1226_v51 = vadd.f32 -1.0, %v1502_v50 }
 0x63a   : > { %v1504_v52 = vpop.eup %1503 }
 0x63b   : > { %v1227_v53 = vadd.f32 -1.0, %v1504_v52  ;;  %v807_v54 = vsel %vm797_vm7, %v791_v41, %v1226_v51 }
 0x63d   : > { %v808_v55 = vsel %vm798_vm9, %v794_v45, %v1227_v53  ;;  %v1492_v45 = vld [vmem:[%s1978_s6 + $0x10] sm:$0xff]  }
 0x63e   : > { %v812_v56 = vpack.c.bf16 %v808_v55, %v807_v54 }
 0x640   : > { %1391 = vmatpush3.bf16.msra.mxu0 %v812_v56 }
 0x641   : > { %1396 = vmatprep.subr.bf16.mxu0 %v1581_v6 }
 0x643   : > { %1393 = vmatmul.mubr.msk.bf16.vlgmr.msra.gmra.mrb[8].mxu0 %vm637_vm2, %v1490_v57 }
 0x644   : > { %1410 = vmatprep.mubr.msk.bf16.mxu0 %vm1585_vm1, %v1581_v6 }
 0x716   : > { %v868_v59 = vpop.f32.mrb[8].mxu0 }
 0x717   : > { %v869_v60 = vadd.f32 %v868_v59, %v819_v58  ;;  %v1394_v61 = vpop.f32.mrb[9].mxu0 }
 0x718   : > { %v871_v63 = vpop.f32.mrb[10].mxu0 }
 0x719   : > { %v877_v0 = vmin.f32 %v869_v60, 0.0  ;;  %v872_v1 = vadd.f32 %v871_v63, %v824_v62  ;;  %v1395_v2 = vpop.f32.mrb[11].mxu0  ;;  %vm875_vm0 = vcmp.gt.f32.partialorder %v869_v60, 0.0 }
 0x71b   : > { %v879_v3 = vmul.f32 1.442695, %v877_v0  ;;  %v878_v4 = vmin.f32 %v872_v1, 0.0  ;;  %vm876_vm1 = vcmp.gt.f32.partialorder %v872_v1, 0.0 }
 0x71d   : > { %1505 = vpow2.f32 %v879_v3  ;;  %v881_v5 = vmul.f32 1.442695, %v878_v4 }
 0x71f   : > { %1507 = vpow2.f32 %v881_v5 }
 0x727   : > { %v1506_v7 = vpop.eup %1505 }
 0x728   : > { %v1234_v8 = vadd.f32 -1.0, %v1506_v7 }
 0x729   : > { %v1508_v9 = vpop.eup %1507 }
 0x72a   : > { %v885_v10 = vsel %vm875_vm0, %v869_v60, %v1234_v8  ;;  %v1235_v11 = vadd.f32 -1.0, %v1508_v9 }
 0x72b   : > { %v1881_v13 = vadd.f32 %v885_v10, %v1821_v23 }
 0x72c   : > { %v886_v12 = vsel %vm876_vm1, %v872_v1, %v1235_v11 }
 0x72d   : > { %v1884_v14 = vadd.f32 %v886_v12, %v1824_v24 }
 0x72f   : > { %v889_v15 = vpack.c.bf16 %v1884_v14, %v1881_v13 }
 0x731   : > { %897 = vrot.lane.b32.xlu0 %v889_v15, %s1594_s25  ;;  %891 = vrot.lane.b32.xlu1 %v889_v15, %s1595_s26 }
 0x735   : > { %909 = vrot.lane.b32.xlu0 %v889_v15, %s1596_s17  ;;  %903 = vrot.lane.b32.xlu1 %v889_v15, %s1597_s18  ;;  %s296_s18 = sand.u32 1, %s1571_s28  }
 0x736   : > { %s1164_s12 = sshll.u32 %s296_s18, 4  ;;  %s1931_s9 = scalar_lea.sflag [#allocation3], %s296_s18 }
 0x737   : > { %s298_s20 = scalar_lea.vmem [#allocation2], %s1164_s12 }
 0x738   : > { %s1098_s19 = sshll.u32 %s298_s20, 4  ;;  %s1928_s19 = int_to_ptr.vmem [resolvable:$true] %s1098_s19 }
 0x739   : > { %920 = vrot.lane.b32.xlu0 %v889_v15, %s1592_s22  ;;  %915 = vrot.lane.b32.xlu1 %v889_v15, %s1591_s21  ;;  %s1517_s25 = scalar_lea.vmem %s1928_s19, 256  ;;  %s1598_s21 = smov [#allocation2]  }
 0x73a   : > { %p1518_p11 = scmp.ne.s32.totalorder %s1928_s19, %s1517_s25  ;;  %s1521_s22 = sshll.u32 %s1598_s21, 4  ;;  %s1522_s22 = int_to_ptr.vmem [resolvable:$false] %s1521_s22 }
 0x73b   : > { %s1523_s26 = scalar_lea.vmem %s1522_s22, 512  ;;  %p1524_p0 = scmp.lt.s32.totalorder %s1928_s19, %s1522_s22 }
 0x73c   : > { %p1519_p12 = pnand %p1518_p11, %p1684_p5  ;;  %p1525_p1 = scmp.lt.s32.totalorder %s1523_s26, %s1517_s25 }
 0x73d   : > { %938 = vperm.xlu0 %1478, %v1239_v16   ;;  %933 = vperm.xlu1 %1479, %v1238_v17  }
 0x73e   : > { %p1520_p13 = pneg %p1519_p12  ;;  %p1526_p2 = por %p1525_p1, %p1524_p0 }
 0x740   : > { %p1527_p3 = pnand %p1526_p2, %p1520_p13 }
 0x741   : > { %1016 = vperm.xlu0 %1478, %v1259_v18   ;;  %1011 = vperm.xlu1 %1479, %v1258_v19  }
 0x7a3   : > { %v892_v20 = vpop.permute.xlu1 %891  ;;  %v898_v21 = vpop.permute.xlu0 %897 }
 0x7a4   : > { %1397 = vmatpush3.bf16.msk.msra.mxu0 %vm1241_vm4, %v892_v20 }
 0x7a5   : > { %1398 = vmatprep.subr.bf16.mxu0 %v1581_v6 }
 0x7a7   : > { %v904_v23 = vpop.permute.xlu1 %903  ;;  %v910_v24 = vpop.permute.xlu0 %909 }
 0x7a8   : > { %1399 = vmatpush3.bf16.msk.msra.mxu0 %vm1243_vm8, %v898_v21 }
 0x7a9   : > { %1400 = vmatprep.subr.bf16.mxu0 %v1581_v6 }
 0x7ab   : > { %v916_v25 = vpop.permute.xlu1 %915  ;;  %v921_v26 = vpop.permute.xlu0 %920 }
 0x7ac   : > { %1401 = vmatpush3.bf16.msk.msra.mxu0 %vm1245_vm11, %v904_v23 }
 0x7ad   : > { %1402 = vmatprep.subr.bf16.mxu0 %v1581_v6 }
 0x7b0   : > { %1403 = vmatpush3.bf16.msk.msra.mxu0 %vm1247_vm13, %v910_v24 }
 0x7b1   : > { %1404 = vmatprep.subr.bf16.mxu0 %v1581_v6 }
 0x7b4   : > { %1405 = vmatpush3.bf16.msk.msra.mxu0 %vm1844_vm6, %v916_v25 }
 0x7b5   : > { %1406 = vmatprep.subr.bf16.mxu0 %v1581_v6 }
 0x7b8   : > { %1407 = vmatpush3.bf16.msk.msra.mxu0 %vm1853_vm15, %v921_v26 }
 0x7b9   : > { %1408 = vmatprep.subr.bf16.mxu0 %v1581_v6 }
 0x7bc   : > { %1409 = vmatpush3.bf16.msra.mxu0 %v889_v15  ;;  %v934_v28 = vpop.permute.xlu1 %933  ;;  %v939_v32 = vpop.permute.xlu0 %938 }
 0x7bf   : > { %1411 = vmatmul.mubr.msk.bf16.vlgmr.msra.gmra.mrb[12].mxu0 %vm560_vm14, %v1491_v27 }
 0x7c0   : > { %v1012_v46 = vpop.permute.xlu1 %1011  ;;  %v1017_v50 = vpop.permute.xlu0 %1016 }
 0x892   : > { %v983_v29 = vpop.f32.mrb[12].mxu0 }
 0x893   : > { %v984_v31 = vadd.f32 %v983_v29, %v934_v28  ;;  %v1412_v30 = vpop.f32.mrb[13].mxu0 }
 0x894   : > { %v986_v33 = vpop.f32.mrb[14].mxu0 }
 0x895   : > { %v992_v35 = vmin.f32 %v984_v31, 0.0  ;;  %v987_v36 = vadd.f32 %v986_v33, %v939_v32  ;;  %v1413_v37 = vpop.f32.mrb[15].mxu0  ;;  %vm990_vm6 = vcmp.gt.f32.partialorder %v984_v31, 0.0 }
 0x897   : > { %v994_v34 = vmul.f32 1.442695, %v992_v35  ;;  %v993_v38 = vmin.f32 %v987_v36, 0.0  ;;  %vm991_vm14 = vcmp.gt.f32.partialorder %v987_v36, 0.0 }
 0x899   : > { %1509 = vpow2.f32 %v994_v34  ;;  %v996_v6 = vmul.f32 1.442695, %v993_v38 }
 0x89b   : > { %1511 = vpow2.f32 %v996_v6 }
 0x8a3   : > { %v1510_v39 = vpop.eup %1509 }
 0x8a4   : > { %v1254_v40 = vadd.f32 -1.0, %v1510_v39 }
 0x8a5   : > { %v1512_v41 = vpop.eup %1511 }
 0x8a6   : > { %v1255_v42 = vadd.f32 -1.0, %v1512_v41  ;;  %v1000_v22 = vsel %vm990_vm6, %v984_v31, %v1254_v40 }
 0x8a8   : > { %v1001_v43 = vsel %vm991_vm14, %v987_v36, %v1255_v42 }
 0x8a9   : > { %v1005_v44 = vpack.c.bf16 %v1001_v43, %v1000_v22 }
 0x8ab   : > { %1415 = vmatpush3.bf16.msra.mxu1 %v1005_v44 }
 0x8ae   : > { %1417 = vmatmul.mubr.msk.bf16.vlgmr.msra.gmra.mrb[12].mxu1 %vm637_vm2, %v1492_v45 }
 0x981   : > { %v1061_v47 = vpop.f32.mrb[12].mxu1 }
 0x982   : > { %v1062_v48 = vadd.f32 %v1061_v47, %v1012_v46  ;;  %v1418_v49 = vpop.f32.mrb[13].mxu1 }
 0x983   : > { %v1064_v51 = vpop.f32.mrb[14].mxu1 }
 0x984   : > { %v1070_v52 = vmin.f32 %v1062_v48, 0.0  ;;  %v1065_v53 = vadd.f32 %v1064_v51, %v1017_v50  ;;  %v1419_v54 = vpop.f32.mrb[15].mxu1  ;;  %vm1068_vm2 = vcmp.gt.f32.partialorder %v1062_v48, 0.0 }
 0x986   : > { %v1072_v55 = vmul.f32 1.442695, %v1070_v52  ;;  %v1071_v56 = vmin.f32 %v1065_v53, 0.0  ;;  %vm1069_vm15 = vcmp.gt.f32.partialorder %v1065_v53, 0.0 }
 0x988   : > { %1513 = vpow2.f32 %v1072_v55  ;;  %v1074_v57 = vmul.f32 1.442695, %v1071_v56 }
 0x98a   : > { %1515 = vpow2.f32 %v1074_v57 }
 0x992   : > { %v1514_v58 = vpop.eup %1513 }
 0x993   : > { %v1262_v59 = vadd.f32 -1.0, %v1514_v58 }
 0x994   : > { %v1516_v60 = vpop.eup %1515 }
 0x995   : > { %v1078_v61 = vsel %vm1068_vm2, %v1062_v48, %v1262_v59  ;;  %v1263_v62 = vadd.f32 -1.0, %v1516_v60 }
 0x996   : > { %v1080_v63 = vadd.f32 %v1078_v61, %v1881_v13 }
 0x997   : > { %v1079_v0 = vsel %vm1069_vm15, %v1065_v53, %v1263_v62 }
 0x998   : > { %1082 = vst [vmem:[%s298_s20] sm:$0xff] %v1080_v63  ;;  %v1081_v1 = vadd.f32 %v1079_v0, %v1884_v14 }
 0x99a   : > { %1083 = vst [vmem:[%s298_s20 + $0x8] sm:$0xff] %v1081_v1 }
 0x99b   : > { %1530 = shalt.err (!%p1527_p3)
}
 0x99c   : > { %s1531_s17 = scalar_lea.hbm %s1926_s24, 256  ;;  %s1535_s13 = scalar_lea.hbm %s1980_s8, 512 }
 0x99d   : > { %p1532_p4 = scmp.ne.s32.totalorder %s1926_s24, %s1531_s17  ;;  %p1536_p9 = scmp.lt.u32.totalorder %s1926_s24, %s1980_s8 }
 0x99e   : > { %p1537_p10 = scmp.lt.u32.totalorder %s1535_s13, %s1531_s17  ;;  %p1539_p12 = scmp.lt.u32.totalorder %s1531_s17, %s1926_s24 }
 0x99f   : > { %p1533_p7 = pnand %p1532_p4, %p1684_p5 }
 0x9a0   : > { %p1538_p11 = por %p1537_p10, %p1536_p9 }
 0x9a1   : > { %p1534_p8 = pneg %p1533_p7 }
 0x9a2   : > { %p1540_p13 = por %p1539_p12, %p1538_p11 }
 0x9a4   : > { %p1541_p0 = pnand %p1540_p13, %p1534_p8 }
 0x9a6   : > { %1544 = shalt.err (!%p1541_p0)
}
 0x9a7   : > { %s1599_s23 = smov 128   ;;  %s1600_s25 = smov 8  }
 0x9a8   : > { %1420 = dma.vmem_to_hbm [thread:$0]  (%p1684_p5), %s1928_s19, 256, %s1926_s24, %s1931_s9, %s1599_s23, %s1599_s23, %s1600_s25  }
 0x9a9 PF: > { %p1426_p1 = scmp.ge.s32.totalorder %s1579_s30, 2  ;;  %s1113_s21 = sand.u32 1, %s1567_s27  }
 0x9aa   : > { %s1114_s22 = scalar_lea.sflag [#allocation3], %s1113_s21 }
 0x9ab   : > { %p1423_p2 = pnand %p1426_p1, %p1688_p6 }
 0x9ad   : > { %1562 = dma.done.wait (!%p1423_p2), %s1114_s22, 256  }
 0x9ae   : > { %1564 = vsyncadd (!%p1423_p2), %s1114_s22, 4294967040  ;;  %p18_p3 = scmp.ge.s32.totalorder %s1671_s11, 4   ;;  %s1995_s27 = smov %s1571_s28 }
 0x9af   : > { %s1996_s28 = smov %s1575_s29  ;;  %s1997_s29 = smov %s1682_s14 }
 0x9b0   : > { %s1998_s30 = smov %s1671_s11  ;;  %20 = sbr.rel (!%p18_p3) target bundleno = 3 (0x3), region = 95 }
 0x9b7   :  { %1119 = vsyncpa [#allocation3], 1 }
 0x9b8   :  { %1121 = vsyncpa [#allocation3 + $0x1], 1 }

</bundles_post_ra>
